<compile_context>
chip_gen: v6e
topology: v6e:2x2x1
jax: 0.10.0
libtpu: 0.0.40
codegen_flags: <defaults>
</compile_context>

<pallas_src>
import jax
import jax.numpy as jnp
from jax.experimental import pallas as pl
from jax.experimental.pallas import tpu as pltpu


def _decoder_seq_kernel(tok_ref,                       # scalar-prefetch: (T,) int32 token ids (SMEM)
                        h0_ref, emb_ref,               # (1,H) initial hidden, (1,1,H) gathered embedding row
                        w_i_ref, w_h_ref,              # (H,3H) fused input / hidden GRU weights  [r|z|n]
                        b_i_ref, b_h_ref,              # (1,3H) fused input / hidden GRU biases   [r|z|n]
                        w_out_ref, b_out_ref,          # (H,O), (1,O) output projection
                        logp_ref, h_ref):              # (1,1,O) per-step log-probs, (1,H) carried hidden
    H = h_ref.shape[-1]
    t = pl.program_id(0)

    # Initialize the resident hidden-state block from the input on the first step.
    @pl.when(t == 0)
    def _():
        h_ref[...] = h0_ref[...]

    # x = relu(Embedding(token))       (F.relu in the PyTorch forward)
    x = jnp.maximum(emb_ref[0], 0.0)                   # (1, H)
    h = h_ref[...]                                     # (1, H)

    # Fused GRU gate matmuls: one MXU push per operand instead of three.
    gi = jnp.dot(x, w_i_ref[...], preferred_element_type=jnp.float32) + b_i_ref[...]   # (1, 3H)
    gh = jnp.dot(h, w_h_ref[...], preferred_element_type=jnp.float32) + b_h_ref[...]   # (1, 3H)

    # PyTorch GRU equations, gate order (r, z, n):
    #   r  = sigmoid(W_ir x + b_ir + W_hr h + b_hr)
    #   z  = sigmoid(W_iz x + b_iz + W_hz h + b_hz)
    #   n  = tanh  (W_in x + b_in + r * (W_hn h + b_hn))
    #   h' = (1 - z) * n + z * h
    r = jax.nn.sigmoid(gi[:, 0:H] + gh[:, 0:H])
    z = jax.nn.sigmoid(gi[:, H:2 * H] + gh[:, H:2 * H])
    n = jnp.tanh(gi[:, 2 * H:3 * H] + r * gh[:, 2 * H:3 * H])
    h_new = (1.0 - z) * n + z * h
    h_ref[...] = h_new                                 # carry across the time axis

    # Output projection + LogSoftmax(dim=1)
    logits = jnp.dot(h_new, w_out_ref[...], preferred_element_type=jnp.float32) + b_out_ref[...]
    m = jnp.max(logits, axis=1, keepdims=True)
    lse = jnp.log(jnp.sum(jnp.exp(logits - m), axis=1, keepdims=True)) + m
    logp_ref[0] = logits - lse


def decoder_rnn_decode(tokens, hidden, params):
    """Run T teacher-forced decoder steps inside ONE pallas_call.

    tokens : (T,) int32 token ids
    hidden : (1, 1, H) float32
    returns: (log_probs (T, output_size), new_hidden (1, 1, H))
    """
    H = params["hidden_size"]
    O = params["output_size"]

    tokens = jnp.asarray(tokens, jnp.int32).reshape(-1)
    T = int(tokens.shape[0])
    h0 = hidden.reshape(1, H).astype(jnp.float32)

    grid_spec = pltpu.PrefetchScalarGridSpec(
        num_scalar_prefetch=1,
        grid=(T,),
        in_specs=[
            pl.BlockSpec((1, H), lambda t, tok: (0, 0)),            # h0 (loaded once)
            pl.BlockSpec((1, 1, H), lambda t, tok: (tok[t], 0, 0)),  # embedding row gather per step
            pl.BlockSpec((H, 3 * H), lambda t, tok: (0, 0)),        # W_i  (VMEM-resident)
            pl.BlockSpec((H, 3 * H), lambda t, tok: (0, 0)),        # W_h  (VMEM-resident)
            pl.BlockSpec((1, 3 * H), lambda t, tok: (0, 0)),        # b_i
            pl.BlockSpec((1, 3 * H), lambda t, tok: (0, 0)),        # b_h
            pl.BlockSpec((H, O), lambda t, tok: (0, 0)),            # W_out (VMEM-resident)
            pl.BlockSpec((1, O), lambda t, tok: (0, 0)),            # b_out
        ],
        out_specs=[
            pl.BlockSpec((1, 1, O), lambda t, tok: (t, 0, 0)),      # per-step log-probs
            pl.BlockSpec((1, H), lambda t, tok: (0, 0)),            # carried hidden (resident)
        ],
    )

    logp, h_new = pl.pallas_call(
        _decoder_seq_kernel,
        grid_spec=grid_spec,
        out_shape=(
            jax.ShapeDtypeStruct((T, 1, O), jnp.float32),
            jax.ShapeDtypeStruct((1, H), jnp.float32),
        ),
        compiler_params=pltpu.CompilerParams(
            dimension_semantics=("arbitrary",)),   # hidden state is carried -> sequential axis
    )(tokens, h0,
      params["embedding"],
      params["w_i"], params["w_h"], params["b_i"], params["b_h"],
      params["w_out"], params["b_out"])

    return logp.reshape(T, O), h_new.reshape(1, 1, H)


def decoder_rnn_forward(token_id, hidden, params):
    """Single-step forward matching DecoderRNN.forward (T=1 special case)."""
    H = params["hidden_size"]
    logp, h_new = decoder_rnn_decode(jnp.reshape(token_id, (1,)), hidden, params)
    return logp.reshape(1, params["output_size"]), h_new.reshape(1, 1, H)


def init_params(key, hidden_size, output_size):
    """Deterministic synthetic parameters matching nn.Embedding / nn.GRU / nn.Linear."""
    ks = jax.random.split(key, 10)
    H, O = hidden_size, output_size
    s = 0.1

    # nn.Embedding(O, H) -- stored as (O, 1, H) so the in-kernel row gather blocks
    # only the leading dim (last two block dims equal the full array dims).
    embedding = jax.random.normal(ks[0], (O, 1, H), jnp.float32) * s

    # nn.GRU weights: weight_ih_l0 / weight_hh_l0 are (3H, H), rows ordered [r|z|n].
    w_ih = jax.random.normal(ks[1], (3 * H, H), jnp.float32) * s
    w_hh = jax.random.normal(ks[2], (3 * H, H), jnp.float32) * s
    b_ih = jax.random.normal(ks[3], (3 * H,), jnp.float32) * s
    b_hh = jax.random.normal(ks[4], (3 * H,), jnp.float32) * s

    # Fused, pre-transposed to (in, out) so the kernel computes x @ W.
    w_i = w_ih.T                      # (H, 3H), column blocks [r|z|n]
    w_h = w_hh.T                      # (H, 3H)
    b_i = b_ih.reshape(1, 3 * H)
    b_h = b_hh.reshape(1, 3 * H)

    # nn.Linear(H, O)
    w_out = (jax.random.normal(ks[5], (O, H), jnp.float32) * s).T    # (H, O)
    b_out = (jax.random.normal(ks[6], (O,), jnp.float32) * s).reshape(1, O)

    return dict(
        hidden_size=H, output_size=O,
        embedding=embedding,
        w_i=w_i, w_h=w_h, b_i=b_i, b_h=b_h,
        w_out=w_out, b_out=b_out,
    )


def _reference_step(token_id, h, p):
    """Pure-JAX reference of one PyTorch DecoderRNN.forward step. h: (1, H)."""
    H = p["hidden_size"]
    x = jnp.maximum(p["embedding"][token_id].reshape(1, H), 0.0)
    gi = x @ p["w_i"] + p["b_i"]
    gh = h @ p["w_h"] + p["b_h"]
    r = jax.nn.sigmoid(gi[:, 0:H] + gh[:, 0:H])
    z = jax.nn.sigmoid(gi[:, H:2 * H] + gh[:, H:2 * H])
    n = jnp.tanh(gi[:, 2 * H:3 * H] + r * gh[:, 2 * H:3 * H])
    h_new = (1.0 - z) * n + z * h
    logits = h_new @ p["w_out"] + p["b_out"]
    return jax.nn.log_softmax(logits, axis=1), h_new


if __name__ == "__main__":
    HIDDEN = 32      # hidden_size
    VOCAB = 16       # output_size
    T = 8            # decode steps for the multi-step (weights-resident) path
    # num_layers=1, bidirectional=False (the defaults used by forward())

    key = jax.random.PRNGKey(0)
    params = init_params(key, HIDDEN, VOCAB)
    hidden0 = jnp.zeros((1, 1, HIDDEN), dtype=jnp.float32)   # init_hidden(batch=1)

    # --- single-step forward (exact module semantics) ---
    token = jnp.array(3, dtype=jnp.int32)
    logp1, h1 = decoder_rnn_forward(token, hidden0, params)
    jax.block_until_ready((logp1, h1))

    ref_logp1, ref_h1 = _reference_step(token, hidden0.reshape(1, HIDDEN), params)
    assert logp1.shape == (1, VOCAB) and h1.shape == (1, 1, HIDDEN)
    assert jnp.allclose(logp1, ref_logp1, atol=1e-5), "single-step log-softmax mismatch"
    assert jnp.allclose(h1.reshape(1, HIDDEN), ref_h1, atol=1e-5), "single-step hidden mismatch"

    # --- multi-step teacher-forced decode in one pallas_call ---
    tokens = jax.random.randint(jax.random.PRNGKey(1), (T,), 0, VOCAB, dtype=jnp.int32)
    logps, hT = decoder_rnn_decode(tokens, hidden0, params)
    jax.block_until_ready((logps, hT))

    h_ref = hidden0.reshape(1, HIDDEN)
    ref_list = []
    for i in range(T):
        lp, h_ref = _reference_step(tokens[i], h_ref, params)
        ref_list.append(lp)
    ref_logps = jnp.concatenate(ref_list, axis=0)

    assert logps.shape == (T, VOCAB) and hT.shape == (1, 1, HIDDEN)
    assert jnp.allclose(logps, ref_logps, atol=1e-5), "multi-step log-softmax mismatch"
    assert jnp.allclose(hT.reshape(1, HIDDEN), h_ref, atol=1e-5), "multi-step hidden mismatch"

    print("KERNEL_OK")
</pallas_src>

<mosaic_0001>
module attributes {stable_mosaic.version = 11 : i64} {
  func.func @_decoder_seq_kernel(%arg0: i32, %arg1: memref<1xi32, #tpu.memory_space<smem>>, %arg2: memref<1x32xf32, #tpu.memory_space<vmem>>, %arg3: memref<1x1x32xf32, #tpu.memory_space<vmem>>, %arg4: memref<32x96xf32, #tpu.memory_space<vmem>>, %arg5: memref<32x96xf32, #tpu.memory_space<vmem>>, %arg6: memref<1x96xf32, #tpu.memory_space<vmem>>, %arg7: memref<1x96xf32, #tpu.memory_space<vmem>>, %arg8: memref<32x16xf32, #tpu.memory_space<vmem>>, %arg9: memref<1x16xf32, #tpu.memory_space<vmem>>, %arg10: memref<1x1x16xf32, #tpu.memory_space<vmem>>, %arg11: memref<1x32xf32, #tpu.memory_space<vmem>>) attributes {dimension_semantics = [#tpu.dimension_semantics<arbitrary>], iteration_bounds = array<i64: 1>, scalar_prefetch = 1 : i64, scratch_operands = 0 : i64, tpu.core_type = #tpu.core_type<tc>, window_params = [{pipeline_mode = #tpu.pipeline_mode<synchronous>, transform_indices = @transform_0, window_bounds = array<i64: 1, 32>}, {transform_indices = @transform_1, window_bounds = array<i64: 1, 1, 32>}, {pipeline_mode = #tpu.pipeline_mode<synchronous>, transform_indices = @transform_2, window_bounds = array<i64: 32, 96>}, {pipeline_mode = #tpu.pipeline_mode<synchronous>, transform_indices = @transform_3, window_bounds = array<i64: 32, 96>}, {pipeline_mode = #tpu.pipeline_mode<synchronous>, transform_indices = @transform_4, window_bounds = array<i64: 1, 96>}, {pipeline_mode = #tpu.pipeline_mode<synchronous>, transform_indices = @transform_5, window_bounds = array<i64: 1, 96>}, {pipeline_mode = #tpu.pipeline_mode<synchronous>, transform_indices = @transform_6, window_bounds = array<i64: 32, 16>}, {pipeline_mode = #tpu.pipeline_mode<synchronous>, transform_indices = @transform_7, window_bounds = array<i64: 1, 16>}, {transform_indices = @transform_8, window_bounds = array<i64: 1, 1, 16>}, {pipeline_mode = #tpu.pipeline_mode<synchronous>, transform_indices = @transform_9, window_bounds = array<i64: 1, 32>}]} {
    %c0_i32 = arith.constant 0 : i32
    %0 = arith.cmpi eq, %arg0, %c0_i32 : i32
    %1 = arith.extui %0 : i1 to i32
    %c0_i32_0 = arith.constant 0 : i32
    %2 = arith.cmpi ne, %1, %c0_i32_0 : i32
    scf.if %2 {
      %c0_30 = arith.constant 0 : index
      %c0_31 = arith.constant 0 : index
      %61 = vector.load %arg2[%c0_30, %c0_31] : memref<1x32xf32, #tpu.memory_space<vmem>>, vector<1x32xf32>
      %c0_32 = arith.constant 0 : index
      %c0_33 = arith.constant 0 : index
      %62 = vector.load %arg11[%c0_32, %c0_33] : memref<1x32xf32, #tpu.memory_space<vmem>>, vector<1x32xf32>
      tpu.vector_store %arg11[%c0_32, %c0_33], %61 {strides = array<i32>} : memref<1x32xf32, #tpu.memory_space<vmem>>, vector<1x32xf32>,
    } else {
    }
    %c0 = arith.constant 0 : index
    %c0_1 = arith.constant 0 : index
    %c0_2 = arith.constant 0 : index
    %3 = vector.load %arg3[%c0, %c0_1, %c0_2] : memref<1x1x32xf32, #tpu.memory_space<vmem>>, vector<1x1x32xf32>
    %4 = vector.shape_cast %3 : vector<1x1x32xf32> to vector<1x32xf32>
    %cst = arith.constant 0.000000e+00 : f32
    %5 = vector.broadcast %cst : f32 to vector<1x32xf32>
    %6 = arith.maximumf %4, %5 : vector<1x32xf32>
    %c0_3 = arith.constant 0 : index
    %c0_4 = arith.constant 0 : index
    %7 = vector.load %arg11[%c0_3, %c0_4] : memref<1x32xf32, #tpu.memory_space<vmem>>, vector<1x32xf32>
    %c0_5 = arith.constant 0 : index
    %c0_6 = arith.constant 0 : index
    %8 = vector.load %arg4[%c0_5, %c0_6] : memref<32x96xf32, #tpu.memory_space<vmem>>, vector<32x96xf32>
    %cst_7 = arith.constant dense<0.000000e+00> : vector<1x96xf32>
    %9 = tpu.matmul %6, %8, %cst_7 {dimension_numbers = #tpu.dot_dimension_numbers<[1], [0], [0], [1], [0, 0, 1, 1], [], []>} : vector<1x32xf32>, vector<32x96xf32>, vector<1x96xf32> -> vector<1x96xf32>
    %c0_8 = arith.constant 0 : index
    %c0_9 = arith.constant 0 : index
    %10 = vector.load %arg6[%c0_8, %c0_9] : memref<1x96xf32, #tpu.memory_space<vmem>>, vector<1x96xf32>
    %11 = arith.addf %9, %10 : vector<1x96xf32>
    %c0_10 = arith.constant 0 : index
    %c0_11 = arith.constant 0 : index
    %12 = vector.load %arg5[%c0_10, %c0_11] : memref<32x96xf32, #tpu.memory_space<vmem>>, vector<32x96xf32>
    %cst_12 = arith.constant dense<0.000000e+00> : vector<1x96xf32>
    %13 = tpu.matmul %7, %12, %cst_12 {dimension_numbers = #tpu.dot_dimension_numbers<[1], [0], [0], [1], [0, 0, 1, 1], [], []>} : vector<1x32xf32>, vector<32x96xf32>, vector<1x96xf32> -> vector<1x96xf32>
    %c0_13 = arith.constant 0 : index
    %c0_14 = arith.constant 0 : index
    %14 = vector.load %arg7[%c0_13, %c0_14] : memref<1x96xf32, #tpu.memory_space<vmem>>, vector<1x96xf32>
    %15 = arith.addf %13, %14 : vector<1x96xf32>
    %16 = vector.extract_strided_slice %11 {offsets = [0, 0], sizes = [1, 32], strides = [1, 1]} : vector<1x96xf32> to vector<1x32xf32>
    %17 = vector.extract_strided_slice %15 {offsets = [0, 0], sizes = [1, 32], strides = [1, 1]} : vector<1x96xf32> to vector<1x32xf32>
    %18 = arith.addf %16, %17 : vector<1x32xf32>
    %19 = arith.negf %18 : vector<1x32xf32>
    %20 = math.exp %19 : vector<1x32xf32>
    %cst_15 = arith.constant 1.000000e+00 : f32
    %21 = vector.broadcast %cst_15 : f32 to vector<1x32xf32>
    %22 = arith.addf %21, %20 : vector<1x32xf32>
    %23 = arith.divf %21, %22 : vector<1x32xf32>
    %24 = vector.extract_strided_slice %11 {offsets = [0, 32], sizes = [1, 32], strides = [1, 1]} : vector<1x96xf32> to vector<1x32xf32>
    %25 = vector.extract_strided_slice %15 {offsets = [0, 32], sizes = [1, 32], strides = [1, 1]} : vector<1x96xf32> to vector<1x32xf32>
    %26 = arith.addf %24, %25 : vector<1x32xf32>
    %27 = arith.negf %26 : vector<1x32xf32>
    %28 = math.exp %27 : vector<1x32xf32>
    %cst_16 = arith.constant 1.000000e+00 : f32
    %29 = vector.broadcast %cst_16 : f32 to vector<1x32xf32>
    %30 = arith.addf %29, %28 : vector<1x32xf32>
    %31 = arith.divf %29, %30 : vector<1x32xf32>
    %32 = vector.extract_strided_slice %11 {offsets = [0, 64], sizes = [1, 32], strides = [1, 1]} : vector<1x96xf32> to vector<1x32xf32>
    %33 = vector.extract_strided_slice %15 {offsets = [0, 64], sizes = [1, 32], strides = [1, 1]} : vector<1x96xf32> to vector<1x32xf32>
    %34 = arith.mulf %23, %33 : vector<1x32xf32>
    %35 = arith.addf %32, %34 : vector<1x32xf32>
    %36 = math.tanh %35 : vector<1x32xf32>
    %cst_17 = arith.constant 1.000000e+00 : f32
    %37 = vector.broadcast %cst_17 : f32 to vector<1x32xf32>
    %38 = arith.subf %37, %31 : vector<1x32xf32>
    %39 = arith.mulf %38, %36 : vector<1x32xf32>
    %40 = arith.mulf %31, %7 : vector<1x32xf32>
    %41 = arith.addf %39, %40 : vector<1x32xf32>
    %c0_18 = arith.constant 0 : index
    %c0_19 = arith.constant 0 : index
    %42 = vector.load %arg11[%c0_18, %c0_19] : memref<1x32xf32, #tpu.memory_space<vmem>>, vector<1x32xf32>
    tpu.vector_store %arg11[%c0_18, %c0_19], %41 {strides = array<i32>} : memref<1x32xf32, #tpu.memory_space<vmem>>, vector<1x32xf32>,
    %c0_20 = arith.constant 0 : index
    %c0_21 = arith.constant 0 : index
    %43 = vector.load %arg8[%c0_20, %c0_21] : memref<32x16xf32, #tpu.memory_space<vmem>>, vector<32x16xf32>
    %cst_22 = arith.constant dense<0.000000e+00> : vector<1x16xf32>
    %44 = tpu.matmul %41, %43, %cst_22 {dimension_numbers = #tpu.dot_dimension_numbers<[1], [0], [0], [1], [0, 0, 1, 1], [], []>} : vector<1x32xf32>, vector<32x16xf32>, vector<1x16xf32> -> vector<1x16xf32>
    %c0_23 = arith.constant 0 : index
    %c0_24 = arith.constant 0 : index
    %45 = vector.load %arg9[%c0_23, %c0_24] : memref<1x16xf32, #tpu.memory_space<vmem>>, vector<1x16xf32>
    %46 = arith.addf %44, %45 : vector<1x16xf32>
    %cst_25 = arith.constant dense<0xFF800000> : vector<1xf32>
    %47 = vector.multi_reduction <maximumf>, %46, %cst_25 [1] : vector<1x16xf32> to vector<1xf32>
    %48 = vector.shape_cast %47 : vector<1xf32> to vector<1x1xf32>
    %49 = vector.broadcast %48 : vector<1x1xf32> to vector<1x16xf32>
    %50 = arith.subf %46, %49 : vector<1x16xf32>
    %51 = math.exp %50 : vector<1x16xf32>
    %cst_26 = arith.constant dense<0.000000e+00> : vector<1xf32>
    %52 = vector.multi_reduction <add>, %51, %cst_26 [1] : vector<1x16xf32> to vector<1xf32>
    %53 = vector.shape_cast %52 : vector<1xf32> to vector<1x1xf32>
    %54 = math.log %53 : vector<1x1xf32>
    %55 = arith.addf %54, %48 : vector<1x1xf32>
    %56 = vector.broadcast %55 : vector<1x1xf32> to vector<1x16xf32>
    %57 = arith.subf %46, %56 : vector<1x16xf32>
    %c0_27 = arith.constant 0 : index
    %c0_28 = arith.constant 0 : index
    %c0_29 = arith.constant 0 : index
    %58 = vector.load %arg10[%c0_27, %c0_28, %c0_29] : memref<1x1x16xf32, #tpu.memory_space<vmem>>, vector<1x1x16xf32>
    %59 = vector.shape_cast %58 : vector<1x1x16xf32> to vector<1x16xf32>
    %60 = vector.shape_cast %57 : vector<1x16xf32> to vector<1x1x16xf32>
    tpu.vector_store %arg10[%c0_27, %c0_28, %c0_29], %60 {strides = array<i32>} : memref<1x1x16xf32, #tpu.memory_space<vmem>>, vector<1x1x16xf32>,
    return
  }
  func.func @transform_0(%arg0: i32, %arg1: memref<1xi32, #tpu.memory_space<smem>>) -> (i32, i32) {
    %c0_i32 = arith.constant 0 : i32
    %c0_i32_0 = arith.constant 0 : i32
    %c0_i32_1 = arith.constant 0 : i32
    return %c0_i32, %c0_i32_0 : i32, i32
  }
  func.func @transform_1(%arg0: i32, %arg1: memref<1xi32, #tpu.memory_space<smem>>) -> (i32, i32, i32) {
    %0 = arith.index_cast %arg0 : i32 to index
    %1 = memref.load %arg1[%0] : memref<1xi32, #tpu.memory_space<smem>>
    %c0_i32 = arith.constant 0 : i32
    %c0_i32_0 = arith.constant 0 : i32
    %c0_i32_1 = arith.constant 0 : i32
    return %1, %c0_i32, %c0_i32_0 : i32, i32, i32
  }
  func.func @transform_2(%arg0: i32, %arg1: memref<1xi32, #tpu.memory_space<smem>>) -> (i32, i32) {
    %c0_i32 = arith.constant 0 : i32
    %c0_i32_0 = arith.constant 0 : i32
    %c0_i32_1 = arith.constant 0 : i32
    return %c0_i32, %c0_i32_0 : i32, i32
  }
  func.func @transform_3(%arg0: i32, %arg1: memref<1xi32, #tpu.memory_space<smem>>) -> (i32, i32) {
    %c0_i32 = arith.constant 0 : i32
    %c0_i32_0 = arith.constant 0 : i32
    %c0_i32_1 = arith.constant 0 : i32
    return %c0_i32, %c0_i32_0 : i32, i32
  }
  func.func @transform_4(%arg0: i32, %arg1: memref<1xi32, #tpu.memory_space<smem>>) -> (i32, i32) {
    %c0_i32 = arith.constant 0 : i32
    %c0_i32_0 = arith.constant 0 : i32
    %c0_i32_1 = arith.constant 0 : i32
    return %c0_i32, %c0_i32_0 : i32, i32
  }
  func.func @transform_5(%arg0: i32, %arg1: memref<1xi32, #tpu.memory_space<smem>>) -> (i32, i32) {
    %c0_i32 = arith.constant 0 : i32
    %c0_i32_0 = arith.constant 0 : i32
    %c0_i32_1 = arith.constant 0 : i32
    return %c0_i32, %c0_i32_0 : i32, i32
  }
  func.func @transform_6(%arg0: i32, %arg1: memref<1xi32, #tpu.memory_space<smem>>) -> (i32, i32) {
    %c0_i32 = arith.constant 0 : i32
    %c0_i32_0 = arith.constant 0 : i32
    %c0_i32_1 = arith.constant 0 : i32
    return %c0_i32, %c0_i32_0 : i32, i32
  }
  func.func @transform_7(%arg0: i32, %arg1: memref<1xi32, #tpu.memory_space<smem>>) -> (i32, i32) {
    %c0_i32 = arith.constant 0 : i32
    %c0_i32_0 = arith.constant 0 : i32
    %c0_i32_1 = arith.constant 0 : i32
    return %c0_i32, %c0_i32_0 : i32, i32
  }
  func.func @transform_8(%arg0: i32, %arg1: memref<1xi32, #tpu.memory_space<smem>>) -> (i32, i32, i32) {
    %c0_i32 = arith.constant 0 : i32
    %c0_i32_0 = arith.constant 0 : i32
    %c0_i32_1 = arith.constant 0 : i32
    return %arg0, %c0_i32, %c0_i32_0 : i32, i32, i32
  }
  func.func @transform_9(%arg0: i32, %arg1: memref<1xi32, #tpu.memory_space<smem>>) -> (i32, i32) {
    %c0_i32 = arith.constant 0 : i32
    %c0_i32_0 = arith.constant 0 : i32
    %c0_i32_1 = arith.constant 0 : i32
    return %c0_i32, %c0_i32_0 : i32, i32
  }
}

</mosaic_0001>

<bundles_post_ra>
// kernel: tpu_custom_call.1
= control target key start
LH: loop header
LB: loop body
LE: loop exit
PB: predicated region body
PF: predicated region fallthrough
CT: control target
= control target key end

     0   :  { %17 = vsyncpa [#allocation5], 0  ;;  %s676_s0 = inlined_call_operand.<no memory space> [shape: s32[1], index: 0, kind: input, shape index: {}]   ;;  %s677_s1 = inlined_call_operand.vmem [shape: f32[1,32], index: 1, kind: input, shape index: {}]   ;;  %s678_s2 = inlined_call_operand.vmem [shape: f32[16,1,32], index: 2, kind: input, shape index: {}]   ;;  %s679_s3 = inlined_call_operand.vmem [shape: f32[32,96], index: 3, kind: input, shape index: {}]   ;;  %s680_s4 = inlined_call_operand.hbm [shape: f32[32,96], index: 4, kind: input, shape index: {}]   ;;  %s681_s5 = inlined_call_operand.vmem [shape: f32[1,96], index: 5, kind: input, shape index: {}]   ;;  %s682_s6 = inlined_call_operand.vmem [shape: f32[1,96], index: 6, kind: input, shape index: {}]   ;;  %s683_s7 = inlined_call_operand.vmem [shape: f32[32,16], index: 7, kind: input, shape index: {}]   ;;  %s684_s8 = inlined_call_operand.vmem [shape: f32[1,16], index: 8, kind: input, shape index: {}]   ;;  %s685_s9 = inlined_call_operand.hbm [shape: f32[1,1,16], index: 9, kind: output, shape index: {0}]   ;;  %s686_s10 = inlined_call_operand.hbm [shape: f32[1,32], index: 10, kind: output, shape index: {1}]  }
   0x1   :  { %18 = vsyncpa [#allocation6], 0 }
   0x2   :  { %19 = vsyncpa [#allocation9], 0  ;;  %s531_s13 = smov [#allocation4]  }
   0x3   :  { %s36_s14 = sshll.u32 %s531_s13, 4  ;;  %s37_s14 = int_to_ptr.vmem [resolvable:$true] %s36_s14 }
   0x4   :  { %s473_s15 = scalar_lea.vmem %s37_s14, 512  ;;  %p478_p1 = scmp.lt.s32.totalorder %s37_s14, %s37_s14 }
   0x5   :  { %p474_p0 = scmp.ne.s32.totalorder %s37_s14, %s473_s15  ;;  %p479_p2 = scmp.lt.s32.totalorder %s473_s15, %s473_s15 }
   0x7   :  { %p480_p3 = por %p479_p2, %p478_p1 }
   0x9   :  { %p481_p4 = pnand %p480_p3, %p474_p0 }
   0xb   :  { %484 = shalt.err (!%p481_p4)
}
   0xc   :  { %s532_s16 = smov 128   ;;  %s533_s17 = smov 8  }
   0xd   :  { %42 = dma.hbm_to_vmem [thread:$0]  %s680_s4, 512, %s37_s14, [#allocation5], %s532_s16, %s532_s16, %s533_s17  }
   0xe   :  { %525 = dma.done.wait [#allocation5], 512  }
   0xf   :  { %526 = vsyncadd [#allocation5], 4294966784  ;;  %p59_p5 = scmp.lt.s32.totalorder %s676_s0, 15  ;;  %v534_v0 = vmov 0.0   ;;  %vm535_vm0 = vmmov 0   ;;  %v76_v1 = vld [vmem:[%s679_s3 + $0x18] sm:$0xff]  ;;  %v254_v30 = vlaneseq }
  0x10   :  { %412 = vmatprep.subr.mxu0 %v534_v0  ;;  %423 = vmatprep.subr.mxu1 %v534_v0  ;;  %v155_v2 = vld [vmem:[#allocation4 + $0x18] sm:$0xff]  ;;  %v75_v3 = vld [vmem:[%s679_s3 + $0x10] sm:$0xff]  ;;  %vm68_vm1 = vcmask 253952   ;;  %v74_v5 = vld [vmem:[%s679_s3 + $0x8] sm:$0xff]  ;;  %vm78_vm2 = vcmask 261120   ;;  %s536_s14 = smov 64  }
  0x11   :  { %420 = vmatprep.mubr.msk.f32.mxu0 %vm535_vm0, %v534_v0  ;;  %431 = vmatprep.mubr.msk.f32.mxu1 %vm535_vm0, %v534_v0  ;;  %s688_s0 = smov (!%p59_p5, %s676_s0), 15  ;;  %v154_v4 = vld [vmem:[#allocation4 + $0x10] sm:$0xff]  ;;  %v153_v6 = vld [vmem:[#allocation4 + $0x8] sm:$0xff]  ;;  %v67_v8 = vld [vmem:[%s677_s1] sm:$0x1]  ;;  %v255_v31 = vshrl.u32 %v254_v30, 7 }
  0x12   :  { %s61_s25 = scalar_lea.vmem %s678_s2, %s688_s0  ;;  %413 = vmatpush3.msra.mxu0 %v76_v1  ;;  %424 = vmatpush3.msra.mxu1 %v155_v2  ;;  %v73_v9 = vld [vmem:[%s679_s3] sm:$0xff]  ;;  %69 = vst.msk [vmem:[#allocation8] sm:$0x1] %vm68_vm1, %v67_v8  ;;  %v272_v32 = vld [vmem:[%s683_s7 + $0x18] sm:$0xff]  ;;  %v271_v33 = vld [vmem:[%s683_s7 + $0x10] sm:$0xff]  ;;  %s537_s4 = smov 96  }
  0x13   :  { %414 = vmatprep.subr.mxu0 %v534_v0  ;;  %425 = vmatprep.subr.mxu1 %v534_v0  ;;  %v70_v7 = vld [vmem:[%s61_s25] sm:$0x1]  ;;  %v256_v34 = vsub.s32 0, %v255_v31  ;;  %v270_v35 = vld [vmem:[%s683_s7 + $0x8] sm:$0xff]  ;;  %s538_s23 = smov 32   ;;  %vm346_vm3 = vcmask 122880  }
  0x14   :  { %415 = vmatpush3.msra.mxu0 %v75_v3  ;;  %426 = vmatpush3.msra.mxu1 %v154_v4  ;;  %v152_v10 = vld [vmem:[#allocation4] sm:$0xff]  ;;  %v71_v11 = vmax.f32 %v70_v7, 0.0  ;;  %s539_s25 = smov [#allocation8]  }
  0x15   :  { %416 = vmatprep.subr.mxu0 %v534_v0  ;;  %427 = vmatprep.subr.mxu1 %v534_v0  ;;  %v156_v14 = vld [vmem:[%s682_s6] sm:$0x1]  ;;  %s377_s26 = sshll.u32 %s539_s25, 4  ;;  %s378_s26 = int_to_ptr.vmem [resolvable:$true] %s377_s26 }
  0x16   :  { %417 = vmatpush3.msra.mxu0 %v74_v5  ;;  %428 = vmatpush3.msra.mxu1 %v153_v6  ;;  %v77_v19 = vld [vmem:[%s681_s5] sm:$0x1]  ;;  %s485_s27 = scalar_lea.vmem %s378_s26, 16  ;;  %p490_p7 = scmp.lt.s32.totalorder %s378_s26, %s378_s26 }
  0x17   :  { %418 = vmatprep.subr.mxu0 %v534_v0  ;;  %429 = vmatprep.subr.mxu1 %v534_v0  ;;  %v269_v37 = vld [vmem:[%s683_s7] sm:$0xff]  ;;  %p486_p6 = scmp.ne.s32.totalorder %s378_s26, %s485_s27 }
  0x18   :  { %419 = vmatpush3.msra.mxu0 %v73_v9  ;;  %430 = vmatpush3.msra.mxu1 %v152_v10  ;;  %v273_v46 = vld [vmem:[%s684_s8] sm:$0x1]  ;;  %s489_s8 = scalar_lea.vmem %s378_s26, 32 }
  0x19   :  { %421 = vmatmul.mubr.msk.f32.vlgmr.msra.gmra.mxu0 %vm78_vm2, %v71_v11  ;;  %434 = vmatprep.subr.mxu0 %v534_v0  ;;  %v72_v12 = vld [vmem:[#allocation8] sm:$0x1]  ;;  %p491_p8 = scmp.lt.s32.totalorder %s489_s8, %s485_s27 }
  0x1a   :  { %442 = vmatprep.mubr.msk.f32.mxu0 %vm535_vm0, %v534_v0  ;;  %432 = vmatmul.mubr.msk.f32.vlgmr.msra.gmra.mxu1 %vm78_vm2, %v72_v12  ;;  %v257_v38 = vrot.slane %v72_v12, %v256_v34 }
  0x1b   :  { %435 = vmatpush3.msra.mxu0 %v272_v32  ;;  %p492_p9 = por %p491_p8, %p490_p7 }
  0x1c   :  { %436 = vmatprep.subr.mxu0 %v534_v0 }
  0x1d   :  { %437 = vmatpush3.msra.mxu0 %v271_v33  ;;  %p493_p10 = pnand %p492_p9, %p486_p6 }
  0x1e   :  { %438 = vmatprep.subr.mxu0 %v534_v0 }
  0x1f   :  { %439 = vmatpush3.msra.mxu0 %v270_v35 }
  0x20   :  { %440 = vmatprep.subr.mxu0 %v534_v0 }
  0x21   :  { %441 = vmatpush3.msra.mxu0 %v269_v37 }
  0xd9   :  { %v148_v13 = vpop.f32.mrf.mxu0 }
  0xda   :  { %v226_v16 = vpop.f32.mrf.mxu1  ;;  %v149_v20 = vadd.f32 %v148_v13, %v77_v19 }
  0xdb   :  { %v422_v15 = vpop.f32.mrf.mxu0  ;;  %v227_v17 = vadd.f32 %v226_v16, %v156_v14 }
  0xdc   :  { %v433_v18 = vpop.f32.mrf.mxu1 }
  0xdd   :  { %238 = vrot.lane.b32.xlu0 %v227_v17, %s536_s14  ;;  %v230_v21 = vadd.f32 %v227_v17, %v149_v20 }
  0xdf   :  { %v395_v22 = vmul.f32 -1.442695, %v230_v21 }
  0xe1   :  { %455 = vpow2.f32 %v395_v22 }
  0xee   :  { %v456_v23 = vpop.eup %455 }
  0xef   :  { %v234_v24 = vadd.f32 1.0, %v456_v23 }
  0xf1   :  { %457 = vrcp.f32 %v234_v24 }
  0xfe   :  { %v458_v25 = vpop.eup %457 }
  0xff   :  { %v248_v40 = vsub.f32 1.0, %v458_v25 }
 0x14f   :  { %v239_v26 = vpop.permute.xlu0 %238 }
 0x150   :  { %v241_v27 = vmul.f32 %v458_v25, %v239_v26 }
 0x152   :  { %243 = vrot.lane.b32.xlu0 %v241_v27, %s536_s14 }
 0x1c4   :  { %v244_v28 = vpop.permute.xlu0 %243 }
 0x1c5   :  { %v246_v29 = vadd.f32 %v244_v28, %v149_v20 }
 0x1c7   :  { %459 = vtanh.f32 %v246_v29 }
 0x1d4   :  { %v460_v36 = vpop.eup %459 }
 0x1d5   :  { %250 = vrot.lane.b32.xlu1 %v460_v36, %s537_s4 }
 0x1d9   :  { %258 = vrot.lane.b32.xlu1 %v257_v38, %s538_s23 }
 0x247   :  { %v251_v39 = vpop.permute.xlu1 %250 }
 0x248   :  { %v253_v42 = vmul.f32 %v251_v39, %v248_v40 }
 0x24b   :  { %v259_v41 = vpop.permute.xlu1 %258 }
 0x24c   :  { %v261_v43 = vmul.f32 %v458_v25, %v259_v41 }
 0x24e   :  { %v262_v44 = vadd.f32 %v261_v43, %v253_v42 }
 0x250   :  { %264 = vrot.lane.b32.xlu0 %v262_v44, %s537_s4 }
 0x2c2   :  { %v265_v45 = vpop.permute.xlu0 %264 }
 0x2c3   :  { %268 = vst.msk [vmem:[#allocation8] sm:$0x1] %vm68_vm1, %v265_v45  ;;  %443 = vmatmul.mubr.msk.f32.vlgmr.msra.gmra.mxu0 %vm78_vm2, %v265_v45 }
 0x383   :  { %v342_v47 = vpop.f32.mrf.mxu0 }
 0x384   :  { %v343_v48 = vadd.f32 %v342_v47, %v273_v46 }
 0x385   :  { %v444_v49 = vpop.f32.mrf.mxu0 }
 0x386   :  { %v347_v50 = vsel %vm346_vm3, %v343_v48, -inf }
 0x387   :  { %348 = vmax.xlane.f32.xlu1 %v347_v50 }
 0x410   :  { %v349_v51 = vpop.xlane.xlu1 %348 }
 0x411   :  { %v350_v52 = vsub.f32 %v343_v48, %v349_v51 }
 0x413   :  { %v351_v53 = vmul.f32 1.442695, %v350_v52 }
 0x415   :  { %461 = vpow2.f32 %v351_v53 }
 0x422   :  { %v462_v54 = vpop.eup %461 }
 0x423   :  { %v353_v55 = vsel %vm346_vm3, %v462_v54, 0.0 }
 0x424   :  { %354 = vadd.xlane.f32.xlu0 %v353_v55 }
 0x425   :  { %496 = shalt.err (!%p493_p10)
}
 0x426   :  { %380 = dma.vmem_to_hbm [thread:$0]  %s378_s26, 16, %s686_s10, [#allocation9]  }
 0x427   :  { %s540_s30 = smov [#allocation7]  }
 0x428   :  { %s367_s11 = sshll.u32 %s540_s30, 4  ;;  %s368_s11 = int_to_ptr.vmem [resolvable:$true] %s367_s11 }
 0x429   :  { %s505_s0 = scalar_lea.vmem %s368_s11, 16  ;;  %s509_s2 = scalar_lea.vmem %s368_s11, 32 }
 0x42a   :  { %p506_p11 = scmp.ne.s32.totalorder %s368_s11, %s505_s0  ;;  %p510_p12 = scmp.lt.s32.totalorder %s368_s11, %s368_s11 }
 0x42b   :  { %p511_p13 = scmp.lt.s32.totalorder %s509_s2, %s505_s0 }
 0x42d   :  { %p512_p0 = por %p511_p13, %p510_p12 }
 0x42f   :  { %p513_p1 = pnand %p512_p0, %p506_p11 }
 0x4ad   :  { %v355_v56 = vpop.xlane.xlu0 %354 }
 0x4ae   :  { %463 = vlog2.f32 %v355_v56 }
 0x4bb   :  { %v464_v57 = vpop.eup %463 }
 0x4bc   :  { %v357_v58 = vmul.f32 0.6931472, %v464_v57 }
 0x4be   :  { %v358_v59 = vadd.f32 %v357_v58, %v349_v51 }
 0x4c0   :  { %v359_v60 = vsub.f32 %v343_v48, %v358_v59 }
 0x4c2   :  { %360 = vst.msk [vmem:[#allocation7] sm:$0x1] %vm346_vm3, %v359_v60 }
 0x4c3   :  { %516 = shalt.err (!%p513_p1)
}
 0x4c4   :  { %370 = dma.vmem_to_hbm [thread:$0]  %s368_s11, 16, %s685_s9, [#allocation6]  }
 0x4c5   :  { %527 = dma.done.wait [#allocation6], 16  }
 0x4c6   :  { %528 = vsyncadd [#allocation6], 4294967280 }
 0x4c7   :  { %529 = dma.done.wait [#allocation9], 16  }
 0x4c8   :  { %530 = vsyncadd [#allocation9], 4294967280 }
 0x4c9   :  { %387 = vsyncpa [#allocation5], 1 }
 0x4ca   :  { %388 = vsyncpa [#allocation6], 1 }
 0x4cb   :  { %389 = vsyncpa [#allocation9], 1 }

</bundles_post_ra>
